<compile_context>
chip_gen: v7x
topology: tpu7x:2x2x1
jax: 0.10.0
libtpu: 0.0.40
codegen_flags: <defaults>
</compile_context>

<pallas_src>
import jax
import jax.numpy as jnp
from jax.experimental import pallas as pl
from jax.experimental.pallas import tpu as pltpu

# ------------------------------ tiny ALBERT config --------------------------
B = 8            # batch (pooled_output rows)
HID = 128        # config.hidden_size
NUM_LABELS = 2   # config.num_labels (SOP head is binary)
LANE = 128       # classifier out-dim padded to one full lane width
SUB = 8          # sublane padding for the bias row block


# --------------------------------- kernel -----------------------------------
def _sop_head_kernel(x_ref, wb_ref, o_ref):
    # classifier dropout: identity in eval mode.
    # TODO(synk): training-mode dropout (classifier_dropout_prob) not implemented.
    x = x_ref[...]                                    # (B, HID)      f32
    w = wb_ref[:HID, :]                               # (HID, LANE)   static slice
    b = wb_ref[HID:HID + 1, :]                        # (1, LANE)     bias row
    logits = jnp.dot(x, w,                            # MXU, f32 accumulate
                     preferred_element_type=jnp.float32)
    o_ref[...] = logits + b                           # (B, LANE) lane-dense store


_COST = pl.CostEstimate(
    flops=2 * B * HID * LANE,
    transcendentals=0,
    bytes_accessed=(B * HID + (HID + SUB) * LANE + B * LANE) * 4,
)


# --------------------------------- wrappers ---------------------------------
def albert_sop_head_padded(pooled_output, wb_pad):
    """pooled_output: (B, HID) -> padded logits slab (B, LANE).

    First NUM_LABELS lanes hold the real logits; remaining lanes are exact
    zeros.  Fused consumers (softmax/argmax/loss) should read the first
    NUM_LABELS lanes directly instead of materialising a sliced array.
    """
    return pl.pallas_call(
        _sop_head_kernel,
        out_shape=jax.ShapeDtypeStruct((B, LANE), jnp.float32),
        in_specs=[
            pl.BlockSpec(memory_space=pltpu.MemorySpace.VMEM),   # pooled_output
            pl.BlockSpec(memory_space=pltpu.MemorySpace.VMEM),   # packed W|b slab
        ],
        out_specs=pl.BlockSpec(memory_space=pltpu.MemorySpace.VMEM),
        cost_estimate=_COST,
    )(pooled_output, wb_pad)


def albert_sop_head(pooled_output, wb_pad):
    """Exact module semantics: (B, HID) -> logits (B, NUM_LABELS)."""
    return albert_sop_head_padded(pooled_output, wb_pad)[:, :NUM_LABELS]


# --------------------------------- params -----------------------------------
def init_params(key):
    """torch nn.Linear(HID, NUM_LABELS)-style init, stored packed & padded."""
    kw, kb = jax.random.split(key)
    bound = 1.0 / jnp.sqrt(jnp.float32(HID))
    w = jax.random.uniform(kw, (HID, NUM_LABELS), jnp.float32, -bound, bound)
    b = jax.random.uniform(kb, (NUM_LABELS,), jnp.float32, -bound, bound)
    # One-time packing into a single lane-dense slab:
    #   rows [0:HID]      -> zero-padded weight (HID, 128)
    #   row  HID          -> zero-padded bias   (128,)
    #   rows HID+1..HID+7 -> zero (sublane alignment)
    wb_pad = jnp.zeros((HID + SUB, LANE), jnp.float32)
    wb_pad = wb_pad.at[:HID, :NUM_LABELS].set(w)
    wb_pad = wb_pad.at[HID, :NUM_LABELS].set(b)
    return {"w": w, "b": b, "wb_pad": wb_pad}


# ------------------------------ pure-JAX reference --------------------------
def _sop_head_ref(pooled_output, w, b):
    # dropout(eval) == identity; logits = pooled @ W + b
    return pooled_output @ w + b


# ----------------------------------- main ------------------------------------
if __name__ == "__main__":
    key = jax.random.PRNGKey(0)
    k_x, k_p = jax.random.split(key)

    pooled_output = jax.random.normal(k_x, (B, HID), jnp.float32)
    params = init_params(k_p)

    # Primary (fusion-friendly) entry point: padded slab, no slice op.
    logits_pad = albert_sop_head_padded(pooled_output, params["wb_pad"])
    logits_pad = jax.block_until_ready(logits_pad)

    # Module-semantics check against the pure-JAX reference.
    ref = _sop_head_ref(pooled_output, params["w"], params["b"])
    logits = logits_pad[:, :NUM_LABELS]
    assert logits_pad.shape == (B, LANE), logits_pad.shape
    assert logits.shape == (B, NUM_LABELS), logits.shape
    assert jnp.allclose(logits, ref, atol=1e-5, rtol=1e-5), (
        float(jnp.max(jnp.abs(logits - ref))))
    # Padded lanes must be exact zeros (so downstream masking is trivial).
    assert jnp.all(logits_pad[:, NUM_LABELS:] == 0.0)

    print("KERNEL_OK")
</pallas_src>

<mosaic_0001>
module attributes {stable_mosaic.version = 11 : i64} {
  func.func @_sop_head_kernel(%arg0: memref<8x128xf32, #tpu.memory_space<vmem>>, %arg1: memref<136x128xf32, #tpu.memory_space<vmem>>, %arg2: memref<8x128xf32, #tpu.memory_space<vmem>>) attributes {dimension_semantics = [], scalar_prefetch = 0 : i64, scratch_operands = 0 : i64, tpu.core_type = #tpu.core_type<tc>} {
    %c0 = arith.constant 0 : index
    %c0_0 = arith.constant 0 : index
    %0 = vector.load %arg0[%c0, %c0_0] : memref<8x128xf32, #tpu.memory_space<vmem>>, vector<8x128xf32>
    %c0_1 = arith.constant 0 : index
    %c0_2 = arith.constant 0 : index
    %1 = vector.load %arg1[%c0_1, %c0_2] : memref<136x128xf32, #tpu.memory_space<vmem>>, vector<128x128xf32>
    %c128 = arith.constant 128 : index
    %c0_3 = arith.constant 0 : index
    %2 = vector.load %arg1[%c128, %c0_3] : memref<136x128xf32, #tpu.memory_space<vmem>>, vector<1x128xf32>
    %cst = arith.constant dense<0.000000e+00> : vector<8x128xf32>
    %3 = tpu.matmul %0, %1, %cst {dimension_numbers = #tpu.dot_dimension_numbers<[1], [0], [0], [1], [0, 0, 1, 1], [], []>} : vector<8x128xf32>, vector<128x128xf32>, vector<8x128xf32> -> vector<8x128xf32>
    %4 = vector.broadcast %2 : vector<1x128xf32> to vector<8x128xf32>
    %5 = arith.addf %3, %4 : vector<8x128xf32>
    %c0_4 = arith.constant 0 : index
    %c0_5 = arith.constant 0 : index
    %6 = vector.load %arg2[%c0_4, %c0_5] : memref<8x128xf32, #tpu.memory_space<vmem>>, vector<8x128xf32>
    tpu.vector_store %arg2[%c0_4, %c0_5], %5 {strides = array<i32>} : memref<8x128xf32, #tpu.memory_space<vmem>>, vector<8x128xf32>,
    return
  }
}

</mosaic_0001>

<bundles_post_ra>
// kernel: tpu_custom_call.1
= control target key start
LH: loop header
LB: loop body
LE: loop exit
PB: predicated region body
PF: predicated region fallthrough
CT: control target
= control target key end

     0   :  { %7 = vsyncpa [#allocation3], 0  ;;  %s370_s0 = inlined_call_operand.hbm [shape: f32[8,128], index: 0, kind: input, shape index: {}]   ;;  %s371_s1 = inlined_call_operand.hbm [shape: f32[136,128], index: 1, kind: input, shape index: {}]   ;;  %s372_s2 = inlined_call_operand.hbm [shape: f32[8,128], index: 2, kind: output, shape index: {}]  }
   0x1   :  { %8 = vsyncpa [#allocation6], 0 }
   0x2   :  { %9 = vsyncpa [#allocation4], 0  ;;  %s304_s9 = smov [#allocation2]   ;;  %s305_s11 = smov [#allocation5]  }
   0x3   :  { %s16_s10 = sshll.u32 %s304_s9, 4  ;;  %s25_s12 = sshll.u32 %s305_s11, 4  ;;  %s17_s10 = int_to_ptr.vmem [resolvable:$true] %s16_s10  ;;  %s327_s12 = int_to_ptr.vmem [resolvable:$true] %s25_s12 }
   0x4   :  { %s232_s15 = scalar_lea.hbm %s370_s0, 128 }
   0x5   :  { %p233_p0 = scmp.ne.s32.totalorder %s370_s0, %s232_s15  ;;  %p236_p1 = scmp.lt.u32.totalorder %s232_s15, %s370_s0 }
   0x7   :  { %p238_p2 = pnand %p236_p1, %p233_p0 }
   0x9   :  { %241 = shalt.err (!%p238_p2)
}
   0xa   :  { %s242_s20 = scalar_lea.vmem %s17_s10, 128  ;;  %p247_p4 = scmp.lt.s32.totalorder %s17_s10, %s17_s10 }
   0xb   :  { %p243_p3 = scmp.ne.s32.totalorder %s17_s10, %s242_s20  ;;  %p248_p5 = scmp.lt.s32.totalorder %s242_s20, %s242_s20 }
   0xd   :  { %p249_p6 = por %p248_p5, %p247_p4 }
   0xf   :  { %p250_p7 = pnand %p249_p6, %p243_p3 }
  0x11   :  { %253 = shalt.err (!%p250_p7)
}
  0x12   :  { %19 = dma.hbm_to_vmem [thread:$0]  %s370_s0, 128, %s17_s10, [#allocation3]  }
  0x13   :  { %s254_s25 = scalar_lea.hbm %s371_s1, 2176 }
  0x14   :  { %p255_p8 = scmp.ne.s32.totalorder %s371_s1, %s254_s25  ;;  %p258_p9 = scmp.lt.u32.totalorder %s254_s25, %s371_s1 }
  0x16   :  { %p260_p10 = pnand %p258_p9, %p255_p8 }
  0x18   :  { %263 = shalt.err (!%p260_p10)
}
  0x19   :  { %s264_s30 = scalar_lea.vmem %s327_s12, 2176  ;;  %p269_p12 = scmp.lt.s32.totalorder %s327_s12, %s327_s12 }
  0x1a   :  { %p265_p11 = scmp.ne.s32.totalorder %s327_s12, %s264_s30  ;;  %p270_p13 = scmp.lt.s32.totalorder %s264_s30, %s264_s30 }
  0x1c   :  { %p271_p0 = por %p270_p13, %p269_p12 }
  0x1e   :  { %p272_p1 = pnand %p271_p0, %p265_p11 }
  0x20   :  { %275 = shalt.err (!%p272_p1)
}
  0x21   :  { %s306_s0 = smov 128   ;;  %s307_s3 = smov 8  }
  0x22   :  { %31 = dma.hbm_to_vmem [thread:$0]  %s371_s1, 2176, %s327_s12, [#allocation6], %s306_s0, %s306_s0, %s307_s3  }
  0x23   :  { %298 = dma.done.wait [#allocation3], 128  }
  0x24   :  { %299 = vsyncadd [#allocation3], 4294967168 }
  0x25   :  { %300 = dma.done.wait [#allocation6], 2176  }
  0x26   :  { %301 = vsyncadd [#allocation6], 4294965120  ;;  %v308_v0 = vmov 0.0|0.0   ;;  %vm309_vm0 = vmmov 0   ;;  %v310_v1 = vmov 0.0   ;;  %v39_v2 = vld [vmem:[#allocation5] sm:$0xff] }
  0x27   :  { %200 = vmatprep.subr.bf16.mxu0 %v308_v0  ;;  %197 = vmatprep.mubr.msk.f32.mxu0 %vm309_vm0, %v310_v1  ;;  %v40_v3 = vld [vmem:[#allocation5 + $0x8] sm:$0xff]  ;;  %v41_v4 = vld [vmem:[#allocation5 + $0x10] sm:$0xff]  ;;  %v42_v6 = vld [vmem:[#allocation5 + $0x18] sm:$0xff]  ;;  %s311_s1 = smov [#allocation7]  }
  0x28   :  { %v201_v5 = vpack.c.bf16 %v40_v3, %v39_v2  ;;  %v204_v7 = vpack.c.bf16 %v42_v6, %v41_v4  ;;  %v43_v8 = vld [vmem:[#allocation5 + $0x20] sm:$0xff]  ;;  %v44_v9 = vld [vmem:[#allocation5 + $0x28] sm:$0xff]  ;;  %v45_v11 = vld [vmem:[#allocation5 + $0x30] sm:$0xff]  ;;  %s137_s6 = sshll.u32 %s311_s1, 4  ;;  %s138_s6 = int_to_ptr.vmem [resolvable:$true] %s137_s6 }
  0x29   :  { %v207_v10 = vpack.c.bf16 %v44_v9, %v43_v8  ;;  %v46_v12 = vld [vmem:[#allocation5 + $0x38] sm:$0xff]  ;;  %v47_v14 = vld [vmem:[#allocation5 + $0x40] sm:$0xff]  ;;  %v48_v15 = vld [vmem:[#allocation5 + $0x48] sm:$0xff]  ;;  %s276_s7 = scalar_lea.vmem %s138_s6, 128  ;;  %p281_p3 = scmp.lt.s32.totalorder %s138_s6, %s138_s6 }
  0x2a   :  { %202 = vmatpush3.bf16.msra.mxu0 %v201_v5  ;;  %v210_v13 = vpack.c.bf16 %v46_v12, %v45_v11  ;;  %v213_v16 = vpack.c.bf16 %v48_v15, %v47_v14  ;;  %v49_v17 = vld [vmem:[#allocation5 + $0x50] sm:$0xff]  ;;  %v50_v18 = vld [vmem:[#allocation5 + $0x58] sm:$0xff]  ;;  %v51_v20 = vld [vmem:[#allocation5 + $0x60] sm:$0xff]  ;;  %p277_p2 = scmp.ne.s32.totalorder %s138_s6, %s276_s7  ;;  %p282_p4 = scmp.lt.s32.totalorder %s276_s7, %s276_s7 }
  0x2b   :  { %203 = vmatprep.subr.bf16.mxu0 %v308_v0  ;;  %v216_v19 = vpack.c.bf16 %v50_v18, %v49_v17  ;;  %v52_v21 = vld [vmem:[#allocation5 + $0x68] sm:$0xff]  ;;  %v53_v23 = vld [vmem:[#allocation5 + $0x70] sm:$0xff]  ;;  %v54_v24 = vld [vmem:[#allocation5 + $0x78] sm:$0xff] }
  0x2c   :  { %v219_v22 = vpack.c.bf16 %v52_v21, %v51_v20  ;;  %v222_v25 = vpack.c.bf16 %v54_v24, %v53_v23  ;;  %v38_v26 = vld [vmem:[#allocation2] sm:$0xff]  ;;  %v147_v27 = vld [vmem:[#allocation5 + $0x80] ss:$0 sm:$0xff]  ;;  %p283_p5 = por %p282_p4, %p281_p3 }
  0x2e   :  { %205 = vmatpush3.bf16.msra.mxu0 %v204_v7  ;;  %p284_p6 = pnand %p283_p5, %p277_p2 }
  0x2f   :  { %206 = vmatprep.subr.bf16.mxu0 %v308_v0 }
  0x32   :  { %208 = vmatpush3.bf16.msra.mxu0 %v207_v10 }
  0x33   :  { %209 = vmatprep.subr.bf16.mxu0 %v308_v0 }
  0x36   :  { %211 = vmatpush3.bf16.msra.mxu0 %v210_v13 }
  0x37   :  { %212 = vmatprep.subr.bf16.mxu0 %v308_v0 }
  0x3a   :  { %214 = vmatpush3.bf16.msra.mxu0 %v213_v16 }
  0x3b   :  { %215 = vmatprep.subr.bf16.mxu0 %v308_v0 }
  0x3e   :  { %217 = vmatpush3.bf16.msra.mxu0 %v216_v19 }
  0x3f   :  { %218 = vmatprep.subr.bf16.mxu0 %v308_v0 }
  0x42   :  { %220 = vmatpush3.bf16.msra.mxu0 %v219_v22 }
  0x43   :  { %221 = vmatprep.subr.bf16.mxu0 %v308_v0 }
  0x46   :  { %223 = vmatpush3.bf16.msra.mxu0 %v222_v25 }
  0x49   :  { %198 = vmatmul.mubr.f32.vlgmr.msra.gmra.mrb[0].mxu0 %v38_v26 }
 0x11c   :  { %v126_v28 = vpop.f32.mrb[0].mxu0 }
 0x11d   :  { %v127_v29 = vadd.f32 %v147_v27, %v126_v28  ;;  %v199_v30 = vpop.f32.mrb[1].mxu0 }
 0x11f   :  { %130 = vst [vmem:[#allocation7] sm:$0xff] %v127_v29 }
 0x120   :  { %287 = shalt.err (!%p284_p6)
}
 0x121   :  { %s288_s10 = scalar_lea.hbm %s372_s2, 128 }
 0x122   :  { %p289_p7 = scmp.ne.s32.totalorder %s372_s2, %s288_s10  ;;  %p292_p8 = scmp.lt.u32.totalorder %s288_s10, %s372_s2 }
 0x124   :  { %p294_p9 = pnand %p292_p8, %p289_p7 }
 0x126   :  { %297 = shalt.err (!%p294_p9)
}
 0x127   :  { %140 = dma.vmem_to_hbm [thread:$0]  %s138_s6, 128, %s372_s2, [#allocation4]  }
 0x128   :  { %302 = dma.done.wait [#allocation4], 128  }
 0x129   :  { %303 = vsyncadd [#allocation4], 4294967168 }
 0x12a   :  { %144 = vsyncpa [#allocation3], 1 }
 0x12b   :  { %145 = vsyncpa [#allocation6], 1 }
 0x12c   :  { %146 = vsyncpa [#allocation4], 1 }

</bundles_post_ra>
